<compile_context>
chip_gen: v5e
topology: v5e:2x2
jax: 0.10.0
libtpu: 0.0.40
codegen_flags: <defaults>
</compile_context>

<pallas_src>
import jax
import jax.numpy as jnp
from jax.experimental import pallas as pl
from jax.experimental.pallas import tpu as pltpu


_TARGET_BLOCK_BYTES = 4 * 1024 * 1024  # per x block; in+out double-buffered ~= 16 MiB VMEM


def _transform_kernel(mean_ref, inv_std_ref, x_ref, o_ref):
    # mean_ref / inv_std_ref: (row_tile, 1) f32 columns, broadcast along the lane axis.
    # x_ref / o_ref:          (row_tile, hw_tile) lane-dense, sublane-dense tiles.
    x = x_ref[...].astype(jnp.float32)
    o_ref[...] = ((x - mean_ref[...]) * inv_std_ref[...]).astype(o_ref.dtype)


def _round_up(v, m):
    return ((v + m - 1) // m) * m


def _choose_tiles(rows, lanes, itemsize):
    """rows/lanes are already padded to (row_pack, 128) multiples."""
    row_pack = max(8, 32 // itemsize)            # sublane packing: 8 f32 / 16 bf16 / 32 int8
    target = _TARGET_BLOCK_BYTES // itemsize     # elements per x block

    # Lane tile: as wide as possible (multiple of 128 dividing `lanes`) while a
    # row_pack-tall block still fits the target.
    hw_tile = lanes
    if row_pack * hw_tile > target:
        hw_tile = max(128, (target // row_pack) // 128 * 128)
        while lanes % hw_tile != 0:
            hw_tile -= 128

    # Row tile: largest multiple of row_pack dividing `rows` that fits the target.
    row_tile = min(rows, max(row_pack, (target // hw_tile) // row_pack * row_pack))
    while rows % row_tile != 0:
        row_tile -= row_pack

    # Keep >= 2 grid steps when the data allows it so the "parallel" row axis can be
    # sharded across v7x's two TensorCores.
    if rows // row_tile == 1 and lanes // hw_tile == 1 and rows >= 2 * row_pack:
        row_tile = max(row_pack, (rows // 2) // row_pack * row_pack)
        while rows % row_tile != 0:
            row_tile -= row_pack
    return row_tile, hw_tile


def transform_layer(x, mean, std):
    """(x - mean[None,:,None,None]) / std[None,:,None,None] in NCHW."""
    N, C, H, W = x.shape
    HW = H * W

    # PyTorch's sub/div against float params yields a float result.
    out_dtype = x.dtype if jnp.issubdtype(x.dtype, jnp.floating) else jnp.float32

    # Per-row (N*C) params in f32; exact reciprocal turns the divide into a VPU multiply.
    mean_f = jnp.asarray(mean, dtype=jnp.float32).reshape(C)
    inv_std_f = (1.0 / jnp.asarray(std, dtype=jnp.float32)).reshape(C)
    mean_col = jnp.tile(mean_f, N).reshape(N * C, 1)
    inv_std_col = jnp.tile(inv_std_f, N).reshape(N * C, 1)

    itemsize = jnp.dtype(x.dtype).itemsize
    row_pack = max(8, 32 // itemsize)
    rows, lanes = N * C, HW
    rows_p, lanes_p = _round_up(rows, row_pack), _round_up(lanes, 128)

    # Lane-dense 2D view; pad so every block store is unmasked (no ragged-HW path).
    xf = x.reshape(rows, lanes)
    if (rows_p, lanes_p) != (rows, lanes):
        xf = jnp.pad(xf, ((0, rows_p - rows), (0, lanes_p - lanes)))
    if rows_p != rows:
        mean_col = jnp.pad(mean_col, ((0, rows_p - rows), (0, 0)))
        inv_std_col = jnp.pad(inv_std_col, ((0, rows_p - rows), (0, 0)))

    row_tile, hw_tile = _choose_tiles(rows_p, lanes_p, itemsize)
    grid = (rows_p // row_tile, lanes_p // hw_tile)

    out_itemsize = jnp.dtype(out_dtype).itemsize
    cost = pl.CostEstimate(
        flops=2 * rows * lanes,
        transcendentals=0,
        bytes_accessed=rows * lanes * (itemsize + out_itemsize) + 2 * rows * 4,
    )

    out = pl.pallas_call(
        _transform_kernel,
        out_shape=jax.ShapeDtypeStruct((rows_p, lanes_p), out_dtype),
        grid_spec=pltpu.PrefetchScalarGridSpec(
            num_scalar_prefetch=0,
            grid=grid,
            in_specs=[
                pl.BlockSpec((row_tile, 1), lambda r, h: (r, 0)),        # mean column
                pl.BlockSpec((row_tile, 1), lambda r, h: (r, 0)),        # 1/std column
                pl.BlockSpec((row_tile, hw_tile), lambda r, h: (r, h)),  # x slab
            ],
            out_specs=pl.BlockSpec((row_tile, hw_tile), lambda r, h: (r, h)),
        ),
        compiler_params=pltpu.CompilerParams(
            dimension_semantics=("parallel", "parallel"),
            vmem_limit_bytes=48 << 20,  # above v5e/v6e scoped defaults, below v7x physical
        ),
        cost_estimate=cost,
    )(mean_col, inv_std_col, xf)

    return out[:rows, :lanes].reshape(N, C, H, W)


if __name__ == "__main__":
    key = jax.random.PRNGKey(0)
    N, C, H, W = 2, 4, 16, 16

    x = jax.random.normal(key, (N, C, H, W), dtype=jnp.float32)
    # Deterministic per-channel normalization parameters (as the module implies).
    mean = jnp.array([0.485, 0.456, 0.406, 0.5], dtype=jnp.float32)
    std = jnp.array([0.229, 0.224, 0.225, 0.25], dtype=jnp.float32)

    out = transform_layer(x, mean, std)
    out = jax.block_until_ready(out)

    ref = (x - mean[None, :, None, None]) / std[None, :, None, None]
    assert out.shape == ref.shape and out.dtype == ref.dtype
    assert jnp.allclose(out, ref, rtol=1e-6, atol=1e-6)

    print("KERNEL_OK")
</pallas_src>

<mosaic_0001>
module attributes {stable_mosaic.version = 11 : i64} {
  func.func @_transform_kernel(%arg0: i32, %arg1: i32, %arg2: memref<8x1xf32, #tpu.memory_space<vmem>>, %arg3: memref<8x1xf32, #tpu.memory_space<vmem>>, %arg4: memref<8x256xf32, #tpu.memory_space<vmem>>, %arg5: memref<8x256xf32, #tpu.memory_space<vmem>>) attributes {dimension_semantics = [#tpu.dimension_semantics<parallel>, #tpu.dimension_semantics<parallel>], iteration_bounds = array<i64: 1, 1>, scalar_prefetch = 0 : i64, scratch_operands = 0 : i64, tpu.core_type = #tpu.core_type<tc>, window_params = [{transform_indices = @transform_0, window_bounds = array<i64: 8, 1>}, {transform_indices = @transform_1, window_bounds = array<i64: 8, 1>}, {transform_indices = @transform_2, window_bounds = array<i64: 8, 256>}, {transform_indices = @transform_3, window_bounds = array<i64: 8, 256>}]} {
    %c0 = arith.constant 0 : index
    %c0_0 = arith.constant 0 : index
    %0 = vector.load %arg4[%c0, %c0_0] : memref<8x256xf32, #tpu.memory_space<vmem>>, vector<8x256xf32>
    %c0_1 = arith.constant 0 : index
    %c0_2 = arith.constant 0 : index
    %1 = vector.load %arg2[%c0_1, %c0_2] : memref<8x1xf32, #tpu.memory_space<vmem>>, vector<8x1xf32>
    %2 = vector.broadcast %1 : vector<8x1xf32> to vector<8x256xf32>
    %3 = arith.subf %0, %2 : vector<8x256xf32>
    %c0_3 = arith.constant 0 : index
    %c0_4 = arith.constant 0 : index
    %4 = vector.load %arg3[%c0_3, %c0_4] : memref<8x1xf32, #tpu.memory_space<vmem>>, vector<8x1xf32>
    %5 = vector.broadcast %4 : vector<8x1xf32> to vector<8x256xf32>
    %6 = arith.mulf %3, %5 : vector<8x256xf32>
    %c0_5 = arith.constant 0 : index
    %c0_6 = arith.constant 0 : index
    %7 = vector.load %arg5[%c0_5, %c0_6] : memref<8x256xf32, #tpu.memory_space<vmem>>, vector<8x256xf32>
    tpu.vector_store %arg5[%c0_5, %c0_6], %6 {strides = array<i32>} : memref<8x256xf32, #tpu.memory_space<vmem>>, vector<8x256xf32>,
    return
  }
  func.func @transform_0(%arg0: i32, %arg1: i32) -> (i32, i32) {
    %c0_i32 = arith.constant 0 : i32
    %c0_i32_0 = arith.constant 0 : i32
    return %arg0, %c0_i32 : i32, i32
  }
  func.func @transform_1(%arg0: i32, %arg1: i32) -> (i32, i32) {
    %c0_i32 = arith.constant 0 : i32
    %c0_i32_0 = arith.constant 0 : i32
    return %arg0, %c0_i32 : i32, i32
  }
  func.func @transform_2(%arg0: i32, %arg1: i32) -> (i32, i32) {
    %c0_i32 = arith.constant 0 : i32
    return %arg0, %arg1 : i32, i32
  }
  func.func @transform_3(%arg0: i32, %arg1: i32) -> (i32, i32) {
    %c0_i32 = arith.constant 0 : i32
    return %arg0, %arg1 : i32, i32
  }
}

</mosaic_0001>

<bundles_post_ra>
// kernel: tpu_custom_call.1
= control target key start
LH: loop header
LB: loop body
LE: loop exit
PB: predicated region body
PF: predicated region fallthrough
CT: control target
= control target key end

     0   :  { %s117_s0 = inlined_call_operand.vmem [shape: f32[8,1], index: 0, kind: input, shape index: {}]   ;;  %s118_s1 = inlined_call_operand.vmem [shape: f32[8,1], index: 1, kind: input, shape index: {}]   ;;  %s119_s2 = inlined_call_operand.vmem [shape: f32[8,256], index: 2, kind: input, shape index: {}]   ;;  %s120_s3 = inlined_call_operand.hbm [shape: f32[8,256], index: 3, kind: output, shape index: {}]  }
   0x1   :  { %v17_v0 = vld [vmem:[%s117_s0] sm:$0xff] }
   0x2   :  { %8 = vsyncpa [#allocation3], 0  ;;  %v80_v1 = vmov 0   ;;  %v25_v2 = vld [vmem:[%s118_s1] sm:$0xff]  ;;  %v16_v5 = vld [vmem:[%s119_s2 + $0x8] sm:$0xff]  ;;  %s81_s0 = smov [#allocation2]  }
   0x3   :  { %53 = vset.pattern.permute.xlu0 %v80_v1  ;;  %v15_v4 = vld [vmem:[%s119_s2] sm:$0xff]  ;;  %s40_s20 = sshll.u32 %s81_s0, 4  ;;  %s42_s23 = sshll.u32 %s120_s3, 4  ;;  %s41_s20 = int_to_ptr.vmem [resolvable:$true] %s40_s20  ;;  %s43_s23 = int_to_ptr.hbm [resolvable:$true] %s42_s23 }
   0x4   :  { %20 = vperm.xlu0 %53, %v17_v0  }
   0xc   :  { %28 = vperm.xlu0 %53, %v25_v2  }
  0x76   :  { %v21_v3 = vpop.permute.xlu0 %20 }
  0x77   :  { %v23_v6 = vsub.f32 %v15_v4, %v21_v3  ;;  %v24_v7 = vsub.f32 %v16_v5, %v21_v3 }
  0x7e   :  { %v29_v8 = vpop.permute.xlu0 %28 }
  0x7f   :  { %v31_v9 = vmul.f32 %v29_v8, %v23_v6  ;;  %v32_v10 = vmul.f32 %v29_v8, %v24_v7 }
  0x81   :  { %33 = vst [vmem:[#allocation2] sm:$0xff] %v31_v9 }
  0x82   :  { %34 = vst [vmem:[#allocation2 + $0x8] sm:$0xff] %v32_v10 }
  0x83   :  { %45 = dma.vmem_to_hbm [thread:$0]  %s41_s20, 256, %s43_s23, [#allocation3]  }
  0x84   :  { %78 = dma.done.wait [#allocation3], 256  }
  0x85   :  { %79 = vsyncadd [#allocation3], 4294967040 }
  0x86   :  { %50 = vsyncpa [#allocation3], 1 }

</bundles_post_ra>
